<compile_context>
chip_gen: v7x
topology: tpu7x:2x2x1
jax: 0.10.0
libtpu: 0.0.40
codegen_flags: <defaults>
</compile_context>

<pallas_src>
import functools

import jax
import jax.numpy as jnp
from jax.experimental import pallas as pl
from jax.experimental.pallas import tpu as pltpu

LANE = 128


def _round_up(v, m):
    return (v + m - 1) // m * m


def _vmem_capacity_bytes():
    try:
        return int(pltpu.get_tpu_info().vmem_capacity_bytes)
    except Exception:
        return 64 << 20  # conservative (v7x per-TensorCore VMEM)


def _pick_tiles(N):
    """Largest lane/sublane-friendly tiles dividing N; keep >=2 row tiles for v7x megacore."""
    assert N % LANE == 0, "node count must be a multiple of 128"

    def pick(cond):
        for c in (512, 256, 128):
            if N % c == 0 and cond(c):
                return c
        return None

    tile_n = pick(lambda c: N // c >= 2) or pick(lambda c: True)
    tile_k = pick(lambda c: True)
    return tile_n, tile_k


# ----------------------------- Pallas kernels ------------------------------

def _xw_kernel(x_ref, w_ref, o_ref):
    # support = X @ W : bf16 x bf16 on the MXU, f32 accumulate, stored in compute dtype.
    o_ref[...] = jnp.dot(x_ref[...], w_ref[...],
                         preferred_element_type=jnp.float32).astype(o_ref.dtype)


def _fused_layer_kernel(*refs, support_resident, tile_k, n_k, apply_relu,
                        has_groupnorm, has_residual, num_valid, inv_group_size, eps):
    # refs layout: support, adj, bias, [gamma, beta, M, M^T], [residual], out, [acc]
    it = iter(refs)
    support_ref = next(it)
    adj_ref = next(it)
    b_ref = next(it)
    if has_groupnorm:
        gamma_ref = next(it)
        beta_ref = next(it)
        m_ref = next(it)
        mt_ref = next(it)
    if has_residual:
        res_ref = next(it)
    o_ref = next(it)
    acc_ref = next(it) if n_k > 1 else None

    k = pl.program_id(1)

    if support_resident:
        # Support is a single VMEM-resident (N, F_pad) block; slice the current K tile.
        start = pl.multiple_of(k * tile_k, tile_k)
        sup = support_ref[pl.ds(start, tile_k), :]
    else:
        sup = support_ref[...]

    # Partial product over one K tile of the node axis (bf16 x bf16 -> f32 on the MXU).
    partial = jnp.dot(adj_ref[...], sup, preferred_element_type=jnp.float32)

    def epilogue(out):
        out = out + b_ref[...]
        if apply_relu:
            out = jnp.maximum(out, 0.0)
        if has_groupnorm:
            # Group statistics via one-hot membership matmuls; mean and E[x^2] share one
            # matmul pair by stacking [out; out*out] along rows (E[x^2]-mean^2 form, f32).
            rows = out.shape[0]
            stacked = jnp.concatenate([out, out * out], axis=0)
            stats_g = jnp.dot(stacked, m_ref[...],
                              preferred_element_type=jnp.float32) * inv_group_size
            stats = jnp.dot(stats_g, mt_ref[...], preferred_element_type=jnp.float32)
            mean = stats[:rows]
            var = jnp.maximum(stats[rows:] - mean * mean, 0.0)
            out = (out - mean) * jax.lax.rsqrt(var + eps) * gamma_ref[...] + beta_ref[...]
        if has_residual:
            out = out + res_ref[...].astype(jnp.float32)
        if num_valid > 0:
            # Masked log-softmax over the first `num_valid` real class columns.
            cols = jax.lax.broadcasted_iota(jnp.int32, out.shape, 1)
            valid = cols < num_valid
            mx = jnp.max(jnp.where(valid, out, -1e30), axis=-1, keepdims=True)
            z = out - mx
            denom = jnp.sum(jnp.where(valid, jnp.exp(z), 0.0), axis=-1, keepdims=True)
            out = z - jnp.log(denom)
        o_ref[...] = out.astype(o_ref.dtype)

    if n_k == 1:
        # Single K step: no accumulator scratch, write the output block directly.
        epilogue(partial)
    else:
        @pl.when(k == 0)
        def _():
            acc_ref[...] = jnp.zeros_like(acc_ref)

        acc_ref[...] += partial

        @pl.when(k == n_k - 1)
        def _():
            epilogue(acc_ref[...])


# ------------------------------ wrappers ------------------------------------

def xw_matmul(x, w, *, tile_n, out_dtype):
    N, F_in = x.shape
    F_out = w.shape[1]
    assert N % tile_n == 0
    return pl.pallas_call(
        _xw_kernel,
        out_shape=jax.ShapeDtypeStruct((N, F_out), out_dtype),
        grid=(N // tile_n,),
        in_specs=[pl.BlockSpec((tile_n, F_in), lambda i: (i, 0)),
                  pl.BlockSpec((F_in, F_out), lambda i: (0, 0))],
        out_specs=pl.BlockSpec((tile_n, F_out), lambda i: (i, 0)),
        compiler_params=pltpu.CompilerParams(dimension_semantics=("parallel",)),
    )(x, w)


def fused_gcn_layer(x, w_pad, adj_q, b_pad, *, apply_relu, gn=None, residual=None,
                    logsoftmax_valid=None, tile_n, tile_k, compute_dtype, out_dtype,
                    eps, vmem_cap):
    """out = adj @ (x @ w_pad) + b, fused with bias/ReLU/GroupNorm/residual/log_softmax."""
    N = x.shape[0]
    F_pad = w_pad.shape[1]
    assert N % tile_n == 0 and N % tile_k == 0 and F_pad % LANE == 0

    # Stage 1: support = X @ W, hoisted out of the adjacency row-tile loop.
    x_c = x if x.dtype == compute_dtype else x.astype(compute_dtype)
    support = xw_matmul(x_c, w_pad.astype(compute_dtype),
                        tile_n=tile_n, out_dtype=compute_dtype)

    csize = jnp.dtype(compute_dtype).itemsize
    osize = jnp.dtype(out_dtype).itemsize
    n_k = N // tile_k

    # Resident support: one VMEM fetch per layer (constant block index) when it fits the
    # per-device budget (tight on v7x's 64 MiB VMEM); otherwise stream per K tile.
    support_bytes = N * F_pad * csize
    support_resident = support_bytes <= min(24 << 20, int(0.35 * vmem_cap))

    has_gn = gn is not None
    has_res = residual is not None
    num_valid = int(logsoftmax_valid) if logsoftmax_valid is not None else 0

    if support_resident:
        support_spec = pl.BlockSpec((N, F_pad), lambda i, k: (0, 0))
    else:
        support_spec = pl.BlockSpec((tile_k, F_pad), lambda i, k: (k, 0))

    in_specs = [
        support_spec,                                          # support
        pl.BlockSpec((tile_n, tile_k), lambda i, k: (i, k)),   # adj row/K tile
        pl.BlockSpec((1, F_pad), lambda i, k: (0, 0)),         # bias
    ]
    inputs = [support, adj_q, b_pad]
    inv_gs = 1.0
    G = 0
    if has_gn:
        gamma_p, beta_p, m, mt, group_size = gn
        G = m.shape[1]
        inv_gs = 1.0 / float(group_size)
        in_specs += [
            pl.BlockSpec((1, F_pad), lambda i, k: (0, 0)),     # gamma
            pl.BlockSpec((1, F_pad), lambda i, k: (0, 0)),     # beta
            pl.BlockSpec((F_pad, G), lambda i, k: (0, 0)),     # membership M
            pl.BlockSpec((G, F_pad), lambda i, k: (0, 0)),     # precomputed M^T
        ]
        inputs += [gamma_p, beta_p, m, mt]
    if has_res:
        in_specs.append(pl.BlockSpec((tile_n, F_pad), lambda i, k: (i, 0)))
        inputs.append(residual)

    kernel = functools.partial(
        _fused_layer_kernel,
        support_resident=support_resident, tile_k=tile_k, n_k=n_k,
        apply_relu=apply_relu, has_groupnorm=has_gn, has_residual=has_res,
        num_valid=num_valid, inv_group_size=inv_gs, eps=eps)

    # Drop the f32 accumulator scratch entirely when the K reduction is a single dot.
    scratch_shapes = [] if n_k == 1 else [pltpu.VMEM((tile_n, F_pad), jnp.float32)]

    vmem_bytes = (
        (2 * support_bytes if support_resident else 2 * tile_k * F_pad * csize)
        + 2 * tile_n * tile_k * csize                     # adj (double-buffered)
        + 2 * tile_n * F_pad * osize                      # output
        + (0 if n_k == 1 else tile_n * F_pad * 4)         # accumulator
        + (2 * tile_n * F_pad * jnp.dtype(residual.dtype).itemsize if has_res else 0)
        + (2 * (4 * F_pad + 2 * F_pad * G) * 4 if has_gn else 2 * F_pad * 4)
        + (2 << 20))                                      # headroom
    vmem_bytes = int(min(max(vmem_bytes, 16 << 20), int(0.9 * vmem_cap)))

    flops = 2 * N * N * F_pad + (8 * N * F_pad * G if has_gn else 0)
    transcendentals = (N * F_pad if has_gn else 0) + (N * F_pad if num_valid else 0)
    bytes_accessed = (
        N * N * csize                                               # adj stream
        + (1 if support_resident else N // tile_n) * N * F_pad * csize
        + N * F_pad * osize
        + (N * F_pad * jnp.dtype(residual.dtype).itemsize if has_res else 0))

    # TODO(synk): if profiling shows exposed DMA behind the GroupNorm/softmax epilogue,
    # add pipeline_mode=pl.Buffered(3) on the adj BlockSpec.
    return pl.pallas_call(
        kernel,
        out_shape=jax.ShapeDtypeStruct((N, F_pad), out_dtype),
        grid=(N // tile_n, n_k),
        in_specs=in_specs,
        out_specs=pl.BlockSpec((tile_n, F_pad), lambda i, k: (i, 0)),
        scratch_shapes=scratch_shapes,
        compiler_params=pltpu.CompilerParams(
            dimension_semantics=("parallel", "arbitrary"),
            vmem_limit_bytes=vmem_bytes),
        cost_estimate=pl.CostEstimate(flops=flops,
                                      transcendentals=transcendentals,
                                      bytes_accessed=bytes_accessed),
    )(*inputs)


# ------------------------- RESKnorm forward (eval) ---------------------------

def init_params(key, nfeat, nhid, nclass, nlayers):
    """GraphConvolution init: W, b ~ U(-1/sqrt(out), 1/sqrt(out)); GroupNorm affine params."""
    dims = [nfeat] + [nhid] * (nlayers - 1) + [nclass]
    ws, bs = [], []
    for li in range(nlayers):
        fin, fout = dims[li], dims[li + 1]
        key, k1, k2 = jax.random.split(key, 3)
        stdv = 1.0 / (fout ** 0.5)
        ws.append(jax.random.uniform(k1, (fin, fout), jnp.float32, -stdv, stdv))
        bs.append(jax.random.uniform(k2, (1, fout), jnp.float32, -stdv, stdv))
    gammas, betas = [], []
    for _ in range(nlayers - 2):
        key, k1, k2 = jax.random.split(key, 3)
        gammas.append(1.0 + 0.1 * jax.random.normal(k1, (1, nhid), jnp.float32))
        betas.append(0.1 * jax.random.normal(k2, (1, nhid), jnp.float32))
    return {"w": ws, "b": bs, "gamma": gammas, "beta": betas}


def res_knorm_forward(x, adj, params, *, num_groups, residue_layers=1, eps=1e-5,
                      compute_dtype=jnp.bfloat16, tile_n=None, tile_k=None):
    """Eval-mode RESKnorm forward (F.dropout == identity)."""
    ws, bs = params["w"], params["b"]
    gammas, betas = params["gamma"], params["beta"]
    nlayers = len(ws)
    nfeat = ws[0].shape[0]
    nhid = ws[0].shape[1]
    nclass = ws[-1].shape[1]
    N = x.shape[0]
    assert nlayers >= 2 + residue_layers
    assert nhid % num_groups == 0

    vmem_cap = _vmem_capacity_bytes()
    auto_n, auto_k = _pick_tiles(N)
    tile_n = tile_n or auto_n
    tile_k = tile_k or auto_k

    feat_pad = _round_up(nfeat, LANE)
    hid_pad = _round_up(nhid, LANE)
    cls_pad = _round_up(nclass, LANE)

    # Zero-pad weights / biases to lane-dense feature widths (padded columns stay 0).
    w_pad, b_pad = [], []
    for li in range(nlayers):
        w, b = ws[li], bs[li]
        fin, fout = w.shape
        fin_p = feat_pad if li == 0 else hid_pad
        fout_p = hid_pad if li < nlayers - 1 else cls_pad
        w_pad.append(jnp.zeros((fin_p, fout_p), jnp.float32).at[:fin, :fout].set(w))
        b_pad.append(jnp.zeros((1, fout_p), jnp.float32).at[:, :fout].set(b))

    group_size = nhid // num_groups
    ch = jnp.arange(hid_pad)
    grp = jnp.arange(num_groups)
    m = ((ch[:, None] // group_size == grp[None, :]) & (ch[:, None] < nhid)
         ).astype(jnp.float32)                       # [hid_pad, G]; padded channels in no group
    mt = m.T                                         # precomputed (no in-kernel transpose)
    gamma_pad = [jnp.zeros((1, hid_pad), jnp.float32).at[:, :nhid].set(g) for g in gammas]
    beta_pad = [jnp.zeros((1, hid_pad), jnp.float32).at[:, :nhid].set(b) for b in betas]

    adj_q = adj.astype(compute_dtype)                # bf16 adj: dominant N^2 HBM stream halved
    # Lane-dense layer-0 input: pad nfeat up to 128 with zero columns.
    x0 = jnp.zeros((N, feat_pad), jnp.float32).at[:, :nfeat].set(x)

    common = dict(tile_n=tile_n, tile_k=tile_k, compute_dtype=compute_dtype,
                  eps=eps, vmem_cap=vmem_cap)

    # Hidden activations stored in bf16 (compute dtype); final layer in f32.
    h = fused_gcn_layer(x0, w_pad[0], adj_q, b_pad[0], apply_relu=True,
                        out_dtype=compute_dtype, **common)

    gather_residue = 1
    r = None
    for li in range(1, nlayers - 1):
        gather_residue -= 1
        if gather_residue == 0:
            r = h
            gather_residue = residue_layers
        add_res = (gather_residue == 1)
        h = fused_gcn_layer(
            h, w_pad[li], adj_q, b_pad[li], apply_relu=True,
            gn=(gamma_pad[li - 1], beta_pad[li - 1], m, mt, group_size),
            residual=(r if add_res else None),
            out_dtype=compute_dtype, **common)
    if gather_residue > 1:
        # Incomplete trailing residual block (host-side tail add; not hit in the demo).
        h = (h.astype(jnp.float32) + r.astype(jnp.float32)).astype(compute_dtype)

    h = fused_gcn_layer(h, w_pad[-1], adj_q, b_pad[-1], apply_relu=False,
                        logsoftmax_valid=nclass, out_dtype=jnp.float32, **common)
    return h[:, :nclass]


# ------------------------------ reference (JAX) ------------------------------

def _reference(x, adj, params, *, num_groups, residue_layers, compute_dtype, eps=1e-5):
    f32 = jnp.float32
    q = lambda a: a.astype(compute_dtype).astype(f32)   # match kernel-side bf16 storage
    adj_q = q(adj)

    def gc(h, w, b):
        support = q(q(h) @ q(w))
        return adj_q @ support + b

    def gn(h, gamma, beta):
        n, c = h.shape
        hg = h.reshape(n, num_groups, c // num_groups)
        mean = hg.mean(-1, keepdims=True)
        var = ((hg - mean) ** 2).mean(-1, keepdims=True)
        y = ((hg - mean) / jnp.sqrt(var + eps)).reshape(n, c)
        return y * gamma + beta

    ws, bs = params["w"], params["b"]
    h = q(jax.nn.relu(gc(x, ws[0], bs[0])))              # hidden activations stored bf16
    gather = 1
    r = None
    for li in range(1, len(ws) - 1):
        gather -= 1
        if gather == 0:
            r = h
            gather = residue_layers
        h = jax.nn.relu(gc(h, ws[li], bs[li]))
        h = gn(h, params["gamma"][li - 1], params["beta"][li - 1])
        if gather == 1:
            h = h + r
        h = q(h)
    if gather > 1:
        h = q(h + r)
    h = gc(h, ws[-1], bs[-1])
    return jax.nn.log_softmax(h, axis=1)


# --------------------------------- main --------------------------------------

if __name__ == "__main__":
    # 256 nodes -> 2 "parallel" row tiles (both v7x TensorCores busy), resident support,
    # single K step (tile_k=256). nhid=64, nclass=8, 3 layers, residue_layers=1 -> one
    # GroupNorm layer with a residual connection.
    N, nfeat, nhid, nclass, nlayers, residue_layers = 256, 32, 64, 8, 3, 1
    num_groups = min(32, nhid)

    key = jax.random.PRNGKey(0)
    kx, kadj, kp = jax.random.split(key, 3)
    x = jax.random.normal(kx, (N, nfeat), jnp.float32)
    # Symmetric row-normalized-ish dense adjacency (deterministic, synthetic).
    a = jax.random.uniform(kadj, (N, N), jnp.float32)
    a = (a + a.T) * 0.5 + jnp.eye(N, dtype=jnp.float32)
    adj = a / jnp.sum(a, axis=1, keepdims=True)

    params = init_params(kp, nfeat, nhid, nclass, nlayers)

    out = res_knorm_forward(x, adj, params, num_groups=num_groups,
                            residue_layers=residue_layers)
    out = jax.block_until_ready(out)

    ref = _reference(x, adj, params, num_groups=num_groups,
                     residue_layers=residue_layers, compute_dtype=jnp.bfloat16)
    assert out.shape == (N, nclass)
    assert jnp.allclose(out, ref, atol=2e-3, rtol=2e-3), "mismatch vs JAX reference"

    print("KERNEL_OK")
</pallas_src>

<mosaic_0001>
module attributes {stable_mosaic.version = 11 : i64} {
  func.func @_xw_kernel(%arg0: i32, %arg1: memref<128x128xbf16, #tpu.memory_space<vmem>>, %arg2: memref<128x128xbf16, #tpu.memory_space<vmem>>, %arg3: memref<128x128xbf16, #tpu.memory_space<vmem>>) attributes {dimension_semantics = [#tpu.dimension_semantics<parallel>], iteration_bounds = array<i64: 2>, scalar_prefetch = 0 : i64, scratch_operands = 0 : i64, tpu.core_type = #tpu.core_type<tc>, window_params = [{transform_indices = @transform_0, window_bounds = array<i64: 128, 128>}, {pipeline_mode = #tpu.pipeline_mode<synchronous>, transform_indices = @transform_1, window_bounds = array<i64: 128, 128>}, {transform_indices = @transform_2, window_bounds = array<i64: 128, 128>}]} {
    %c0 = arith.constant 0 : index
    %c0_0 = arith.constant 0 : index
    %0 = vector.load %arg1[%c0, %c0_0] : memref<128x128xbf16, #tpu.memory_space<vmem>>, vector<128x128xbf16>
    %c0_1 = arith.constant 0 : index
    %c0_2 = arith.constant 0 : index
    %1 = vector.load %arg2[%c0_1, %c0_2] : memref<128x128xbf16, #tpu.memory_space<vmem>>, vector<128x128xbf16>
    %cst = arith.constant dense<0.000000e+00> : vector<128x128xf32>
    %2 = tpu.matmul %0, %1, %cst {dimension_numbers = #tpu.dot_dimension_numbers<[1], [0], [0], [1], [0, 0, 1, 1], [], []>} : vector<128x128xbf16>, vector<128x128xbf16>, vector<128x128xf32> -> vector<128x128xf32>
    %3 = arith.truncf %2 : vector<128x128xf32> to vector<128x128xbf16>
    %c0_3 = arith.constant 0 : index
    %c0_4 = arith.constant 0 : index
    %4 = vector.load %arg3[%c0_3, %c0_4] : memref<128x128xbf16, #tpu.memory_space<vmem>>, vector<128x128xbf16>
    tpu.vector_store %arg3[%c0_3, %c0_4], %3 {strides = array<i32>} : memref<128x128xbf16, #tpu.memory_space<vmem>>, vector<128x128xbf16>,
    return
  }
  func.func @transform_0(%arg0: i32) -> (i32, i32) {
    %c0_i32 = arith.constant 0 : i32
    %c0_i32_0 = arith.constant 0 : i32
    return %arg0, %c0_i32 : i32, i32
  }
  func.func @transform_1(%arg0: i32) -> (i32, i32) {
    %c0_i32 = arith.constant 0 : i32
    %c0_i32_0 = arith.constant 0 : i32
    %c0_i32_1 = arith.constant 0 : i32
    return %c0_i32, %c0_i32_0 : i32, i32
  }
  func.func @transform_2(%arg0: i32) -> (i32, i32) {
    %c0_i32 = arith.constant 0 : i32
    %c0_i32_0 = arith.constant 0 : i32
    return %arg0, %c0_i32 : i32, i32
  }
}

</mosaic_0001>

<bundles_post_ra>
// kernel: tpu_custom_call.1
= control target key start
LH: loop header
LB: loop body
LE: loop exit
PB: predicated region body
PF: predicated region fallthrough
CT: control target
= control target key end

     0   :  { %7 = vsyncpa [#allocation3], 0  ;;  %s1209_s0 = inlined_call_operand.hbm [shape: bf16[256,128], index: 0, kind: input, shape index: {}]   ;;  %s1210_s1 = inlined_call_operand.hbm [shape: bf16[128,128], index: 1, kind: input, shape index: {}]   ;;  %s1211_s2 = inlined_call_operand.hbm [shape: bf16[256,128], index: 2, kind: output, shape index: {}]  }
   0x1   :  { %9 = vsyncpa [#allocation3 + $0x1], 0 }
   0x2   :  { %10 = vsyncpa [#allocation6], 0 }
   0x3   :  { %11 = vsyncpa [#allocation4], 0 }
   0x4   :  { %13 = vsyncpa [#allocation4 + $0x1], 0  ;;  %s988_s9 = smov 0   ;;  %s990_s10 = smov 0  }
   0x5   :  { %s992_s11 = smov 0   ;;  %s994_s12 = smov 0  }
   0x6 LB: > { %s1009_s13 = sadd.s32 4294967295, %s964_s12   ;;  %s582_s14 = sadd.s32 4294967294, %s964_s12   ;;  %s964_s12 = sphi %s994_s12, %s1231_s12   ;;  %s960_s11 = sphi %s992_s11, %s1230_s11   ;;  %s956_s10 = sphi %s990_s10, %s1229_s10   ;;  %s952_s9 = sphi %s988_s9, %s1228_s9  }
   0x7   : > { %p39_p0 = scmp.ne.s32.totalorder %s956_s10, %s952_s9  ;;  %p1212_p1 = scmp.eq.s32.totalorder %s1009_s13, 0 }
   0x8   : > { %p90_p3 = scmp.eq.s32.totalorder %s582_s14, 1  ;;  %p583_p5 = scmp.ge.s32.totalorder %s964_s12, 1 }
   0x9   : > { %p1018_p4 = por %p1212_p1, %p39_p0  ;;  %p97_p7 = scmp.lt.s32.totalorder %s964_s12, 3 }
   0xa   : > { %p1023_p6 = por %p90_p3, %p39_p0  ;;  %s966_s18 = smov [#allocation5]  }
   0xb   : > { %s1215_s15 = scalar_select %p1018_p4, 1, 0 }
   0xc   : > { %s1216_s16 = scalar_select %p1023_p6, 1, 0 }
   0xd   : > { %p1028_p8 = pnand %p583_p5, %p97_p7  ;;  %s109_s19 = sshll.u32 %s966_s18, 4  ;;  %s1032_s19 = int_to_ptr.vmem [resolvable:$true] %s109_s19 }
   0xe   : > { %s1044_s21 = sadd.s32 1, %s964_s12   ;;  %s26_s22 = sadd.s32 1, %s960_s11 }
   0xf   : > { %s1217_s17 = scalar_select %p1028_p8, 1, 0 }
  0x10   : > { %p767_p9 = pneg %p1028_p8  ;;  %s23_s23 = ssub.s32 %s964_s12, %s1044_s21 }
  0x11   : > { %s836_s26 = scalar_lea.hbm %s1210_s1, 1024 }
  0x12   : > { %p1039_p11 = pnand %p767_p9, %p1212_p1  ;;  %p837_p12 = scmp.ne.s32.totalorder %s1210_s1, %s836_s26 }
  0x13   : > { %p843_p5 = scmp.lt.u32.totalorder %s836_s26, %s1210_s1 }
  0x14   : > { %p838_p13 = pneg %p1039_p11 }
  0x16   : > { %p839_p0 = pnand %p838_p13, %p837_p12 }
  0x18   : > { %p840_p3 = pneg %p839_p0 }
  0x1a   : > { %p845_p7 = pnand %p843_p5, %p840_p3 }
  0x1c   : > { %848 = shalt.err (!%p845_p7)
}
  0x1d   : > { %s849_s3 = scalar_lea.vmem %s1032_s19, 1024  ;;  %p857_p2 = scmp.lt.s32.totalorder %s1032_s19, %s1032_s19 }
  0x1e   : > { %p850_p9 = scmp.ne.s32.totalorder %s1032_s19, %s849_s3  ;;  %p858_p6 = scmp.lt.s32.totalorder %s849_s3, %s849_s3 }
  0x20   : > { %p852_p10 = pnand %p850_p9, %p838_p13  ;;  %p859_p4 = por %p858_p6, %p857_p2 }
  0x22   : > { %p853_p1 = pneg %p852_p10 }
  0x24   : > { %p860_p8 = pnand %p859_p4, %p853_p1 }
  0x26   : > { %863 = shalt.err (!%p860_p8)
}
  0x27   : > { %s967_s4 = smov 64   ;;  %s968_s5 = smov 4  }
  0x28   : > { %770 = dma.hbm_to_vmem [thread:$0]  (!%p1039_p11), %s1210_s1, 1024, %s1032_s19, [#allocation6], %s967_s4, %s967_s4, %s968_s5  }
  0x29   : > { %p24_p1 = scmp.eq.s32.totalorder %s23_s23, 0  ;;  %p33_p2 = scmp.ne.s32.totalorder %s960_s11, %s956_s10 }
  0x2a   : > { %p34_p4 = scmp.eq.s32.totalorder %s964_s12, 0  ;;  %p780_p6 = scmp.lt.s32.totalorder %s964_s12, 2 }
  0x2b   : > { %s1078_s8 = scalar_select %p24_p1, %s960_s11, %s26_s22  }
  0x2c   : > { %p35_p8 = por %p34_p4, %p33_p2  ;;  %p1219_p10 = scmp.eq.s32.totalorder %s1009_s13, 1 }
  0x2d   : > { %s123_s18 = sand.u32 1, %s960_s11   ;;  %s630_s20 = sshll.u32 %s964_s12, 10 }
  0x2e   : > { %p1082_p12 = por %p1219_p10, %p33_p2  ;;  %s586_s24 = sshll.u32 %s123_s18, 6 }
  0x2f   : > { %s1091_s27 = scalar_lea.hbm %s1209_s0, %s630_s20  ;;  %s127_s19 = scalar_lea.vmem [#allocation2], %s586_s24 }
  0x30   : > { %s134_s22 = sshll.u32 %s127_s19, 4  ;;  %p1093_p11 = pnand %p780_p6, %p35_p8  ;;  %s1097_s22 = int_to_ptr.vmem [resolvable:$true] %s134_s22 }
  0x31   : > { %s1099_s28 = scalar_lea.sflag [#allocation3], %s123_s18  ;;  %s864_s29 = scalar_lea.hbm %s1091_s27, 1024 }
  0x32   : > { %p865_p13 = scmp.ne.s32.totalorder %s1091_s27, %s864_s29  ;;  %p866_p0 = pneg %p1093_p11 }
  0x33   : > { %s869_s6 = scalar_lea.hbm %s1209_s0, 2048  ;;  %p870_p7 = scmp.lt.u32.totalorder %s1091_s27, %s1209_s0 }
  0x34   : > { %p867_p3 = pnand %p866_p0, %p865_p13  ;;  %p871_p9 = scmp.lt.u32.totalorder %s869_s6, %s864_s29 }
  0x35   : > { %p873_p2 = scmp.lt.u32.totalorder %s864_s29, %s1091_s27 }
  0x36   : > { %p868_p5 = pneg %p867_p3  ;;  %p872_p1 = por %p871_p9, %p870_p7 }
  0x38   : > { %p874_p4 = por %p873_p2, %p872_p1 }
  0x3a   : > { %p875_p6 = pnand %p874_p4, %p868_p5 }
  0x3c   : > { %878 = shalt.err (!%p875_p6)
}
  0x3d   : > { %s879_s18 = scalar_lea.vmem %s1097_s22, 1024  ;;  %s969_s24 = smov [#allocation2]  }
  0x3e   : > { %p880_p8 = scmp.ne.s32.totalorder %s1097_s22, %s879_s18  ;;  %s884_s25 = sshll.u32 %s969_s24, 4  ;;  %s885_s25 = int_to_ptr.vmem [resolvable:$false] %s884_s25 }
  0x3f   : > { %s886_s26 = scalar_lea.vmem %s885_s25, 2048  ;;  %p887_p3 = scmp.lt.s32.totalorder %s1097_s22, %s885_s25 }
  0x40   : > { %p882_p10 = pnand %p880_p8, %p866_p0  ;;  %p888_p7 = scmp.lt.s32.totalorder %s886_s26, %s879_s18 }
  0x42   : > { %p883_p13 = pneg %p882_p10  ;;  %p889_p9 = por %p888_p7, %p887_p3 }
  0x44   : > { %p890_p1 = pnand %p889_p9, %p883_p13 }
  0x46   : > { %893 = shalt.err (!%p890_p1)
}
  0x47   : > { %774 = dma.hbm_to_vmem [thread:$0]  (!%p1093_p11), %s1091_s27, 1024, %s1097_s22, %s1099_s28, %s967_s4, %s967_s4, %s968_s5  }
  0x48   : > { %p1222_p0 = scmp.ne.s32.totalorder %s1217_s17, 0 }
  0x49   : > { %s1133_s19 = sand.u32 (!%p1222_p0), 1, %s956_s10   ;;  %p1223_p5 = scmp.ne.s32.totalorder (!%p1222_p0), %s1215_s15, 0 }
  0x4a   : > { %146 = sbr.rel (%p1222_p0) target bundleno = 358 (0x166), region = 28  ;;  %s590_s29 = sshll.u32 (!%p1222_p0), %s1133_s19, 6 }
  0x4b   : > { %s149_s30 = scalar_lea.sflag (!%p1222_p0), [#allocation3], %s1133_s19  ;;  %s1139_s23 = scalar_lea.vmem (!%p1222_p0), [#allocation2], %s590_s29 }
  0x51   : > { %939 = dma.done.wait (%p1223_p5), %s149_s30, 1024  }
  0x52   : > { %941 = vsyncadd (%p1223_p5), %s149_s30, 4294966272  ;;  %p1224_p11 = scmp.eq.s32.totalorder %s1009_s13, 0 }
  0x54   : > { %943 = dma.done.wait (%p1224_p11), [#allocation6], 1024   ;;  %p1225_p2 = pmov %p1224_p11 }
  0x55   : > { %v820_v0 = vld [vmem:[#allocation5] sm:$0xff]   ;;  %v821_v1 = vld [vmem:[#allocation5 + $0x8] sm:$0xff]   ;;  %v822_v2 = vld [vmem:[#allocation5 + $0x10] sm:$0xff]   ;;  %s176_s15 = scalar_lea.vmem [#allocation7], %s590_s29  ;;  %s647_s4 = sshll.u32 %s1009_s13, 10 }
  0x56   : > { %945 = vsyncadd (%p1225_p2), [#allocation6], 4294966272  ;;  %711 = vmatprep.subr.bf16.mxu0 %v820_v0  ;;  %743 = vmatprep.subr.bf16.mxu1 %v820_v0  ;;  %v823_v3 = vld [vmem:[#allocation5 + $0x18] sm:$0xff]   ;;  %v828_v4 = vld [vmem:[%s1139_s23] sm:$0xff]   ;;  %s499_s17 = sshll.u32 %s176_s15, 4  ;;  %s1165_s22 = scalar_lea.hbm %s1211_s2, %s647_s4  ;;  %s1160_s17 = int_to_ptr.vmem [resolvable:$true] %s499_s17 }
  0x57   : > { %712 = vmatpush3.bf16.msra.mxu0 %v820_v0  ;;  %751 = vmatpush3.bf16.msra.mxu1 %v820_v0  ;;  %v829_v5 = vld [vmem:[%s1139_s23 + $0x20] sm:$0xff]   ;;  %v825_v7 = vld [vmem:[#allocation5 + $0x28] sm:$0xff]   ;;  %v826_v8 = vld [vmem:[#allocation5 + $0x30] sm:$0xff]   ;;  %s486_s13 = scalar_lea.sflag [#allocation4], %s1133_s19  ;;  %s894_s28 = scalar_lea.vmem %s1160_s17, 1024 }
  0x58   : > { %713 = vmatprep.subr.bf16.mxu0 %v821_v1  ;;  %744 = vmatprep.subr.bf16.mxu1 %v821_v1  ;;  %v824_v6 = vld [vmem:[#allocation5 + $0x20] sm:$0xff]   ;;  %v827_v9 = vld [vmem:[#allocation5 + $0x38] sm:$0xff]   ;;  %v830_v10 = vld [vmem:[%s1139_s23 + $0x8] sm:$0xff]   ;;  %p895_p4 = scmp.ne.s32.totalorder %s1160_s17, %s894_s28  ;;  %s970_s3 = smov [#allocation7]  }
  0x59   : > { %727 = vmatprep.mubr.bf16.mxu0 %v828_v4  ;;  %735 = vmatprep.mubr.bf16.mxu1 %v829_v5  ;;  %v831_v11 = vld [vmem:[%s1139_s23 + $0x28] sm:$0xff]   ;;  %v832_v12 = vld [vmem:[%s1139_s23 + $0x10] sm:$0xff]   ;;  %v834_v14 = vld [vmem:[%s1139_s23 + $0x18] sm:$0xff]   ;;  %s898_s6 = sshll.u32 %s970_s3, 4  ;;  %s899_s6 = int_to_ptr.vmem [resolvable:$false] %s898_s6 }
  0x5a   : > { %v833_v13 = vld [vmem:[%s1139_s23 + $0x30] sm:$0xff]   ;;  %v835_v15 = vld [vmem:[%s1139_s23 + $0x38] sm:$0xff]   ;;  %p896_p6 = pnand %p895_p4, %p1082_p12  ;;  %s900_s7 = scalar_lea.vmem %s899_s6, 2048 }
  0x5b   : > { %714 = vmatpush3.bf16.msra.mxu0 %v821_v1  ;;  %752 = vmatpush3.bf16.msra.mxu1 %v821_v1  ;;  %p901_p10 = scmp.lt.s32.totalorder %s1160_s17, %s899_s6  ;;  %p902_p13 = scmp.lt.s32.totalorder %s900_s7, %s894_s28 }
  0x5c   : > { %715 = vmatprep.subr.bf16.mxu0 %v822_v2  ;;  %745 = vmatprep.subr.bf16.mxu1 %v822_v2  ;;  %p897_p8 = pneg %p896_p6 }
  0x5d   : > { %p903_p3 = por %p902_p13, %p901_p10 }
  0x5f   : > { %716 = vmatpush3.bf16.msra.mxu0 %v822_v2  ;;  %753 = vmatpush3.bf16.msra.mxu1 %v822_v2  ;;  %p904_p7 = pnand %p903_p3, %p897_p8 }
  0x60   : > { %717 = vmatprep.subr.bf16.mxu0 %v823_v3  ;;  %746 = vmatprep.subr.bf16.mxu1 %v823_v3 }
  0x63   : > { %718 = vmatpush3.bf16.msra.mxu0 %v823_v3  ;;  %754 = vmatpush3.bf16.msra.mxu1 %v823_v3 }
  0x64   : > { %719 = vmatprep.subr.bf16.mxu0 %v824_v6  ;;  %747 = vmatprep.subr.bf16.mxu1 %v824_v6 }
  0x67   : > { %720 = vmatpush3.bf16.msra.mxu0 %v824_v6  ;;  %755 = vmatpush3.bf16.msra.mxu1 %v824_v6 }
  0x68   : > { %721 = vmatprep.subr.bf16.mxu0 %v825_v7  ;;  %748 = vmatprep.subr.bf16.mxu1 %v825_v7 }
  0x6b   : > { %722 = vmatpush3.bf16.msra.mxu0 %v825_v7  ;;  %756 = vmatpush3.bf16.msra.mxu1 %v825_v7 }
  0x6c   : > { %723 = vmatprep.subr.bf16.mxu0 %v826_v8  ;;  %749 = vmatprep.subr.bf16.mxu1 %v826_v8 }
  0x6f   : > { %724 = vmatpush3.bf16.msra.mxu0 %v826_v8  ;;  %757 = vmatpush3.bf16.msra.mxu1 %v826_v8 }
  0x70   : > { %725 = vmatprep.subr.bf16.mxu0 %v827_v9  ;;  %750 = vmatprep.subr.bf16.mxu1 %v827_v9 }
  0x73   : > { %726 = vmatpush3.bf16.msra.mxu0 %v827_v9  ;;  %758 = vmatpush3.bf16.msra.mxu1 %v827_v9 }
  0x76   : > { %728 = vmatmul.mubr.bf16.vlgmr.msra.gmra.mrb[0].mxu0 %v830_v10  ;;  %736 = vmatmul.mubr.bf16.vlgmr.msra.gmra.mrb[0].mxu1 %v831_v11 }
  0x77   : > { %731 = vmatprep.mubr.bf16.mxu0 %v832_v12  ;;  %739 = vmatprep.mubr.bf16.mxu1 %v833_v13 }
  0x7e   : > { %732 = vmatmul.mubr.bf16.gmra.mrb[4].mxu0 %v834_v14  ;;  %740 = vmatmul.mubr.bf16.gmra.mrb[4].mxu1 %v835_v15 }
 0x149   : > { %v729_v16 = vpop.f32.mrb[0].mxu0  ;;  %v737_v17 = vpop.f32.mrb[0].mxu1 }
 0x14a   : > { %v342_v18 = vpop.f32.mrb[1].mxu0  ;;  %v374_v19 = vpop.f32.mrb[1].mxu1 }
 0x14b   : > { %v730_v20 = vpop.f32.mrb[2].mxu0  ;;  %v738_v21 = vpop.f32.mrb[2].mxu1 }
 0x14c   : > { %v656_v22 = vpack.c.bf16 %v730_v20, %v729_v16  ;;  %v676_v23 = vpack.c.bf16 %v738_v21, %v737_v17  ;;  %v345_v24 = vpop.f32.mrb[3].mxu0  ;;  %v377_v25 = vpop.f32.mrb[3].mxu1 }
 0x14d   : > { %v651_v26 = vpack.c.bf16 %v345_v24, %v342_v18  ;;  %v671_v27 = vpack.c.bf16 %v377_v25, %v374_v19 }
 0x14e   : > { %688 = vst [vmem:[%s176_s15 + $0x8] sm:$0xff] %v656_v22   ;;  %692 = vst [vmem:[%s176_s15 + $0x28] sm:$0xff] %v676_v23  }
 0x14f   : > { %652 = vst [vmem:[%s176_s15] sm:$0xff] %v651_v26   ;;  %691 = vst [vmem:[%s176_s15 + $0x20] sm:$0xff] %v671_v27  }
 0x151   : > { %v733_v28 = vpop.f32.mrb[4].mxu0  ;;  %v741_v29 = vpop.f32.mrb[4].mxu1 }
 0x152   : > { %v358_v30 = vpop.f32.mrb[5].mxu0  ;;  %v390_v31 = vpop.f32.mrb[5].mxu1 }
 0x153   : > { %v734_v32 = vpop.f32.mrb[6].mxu0  ;;  %v742_v33 = vpop.f32.mrb[6].mxu1 }
 0x154   : > { %v666_v34 = vpack.c.bf16 %v734_v32, %v733_v28  ;;  %v686_v35 = vpack.c.bf16 %v742_v33, %v741_v29  ;;  %v361_v36 = vpop.f32.mrb[7].mxu0  ;;  %v393_v37 = vpop.f32.mrb[7].mxu1 }
 0x155   : > { %v661_v38 = vpack.c.bf16 %v361_v36, %v358_v30  ;;  %v681_v39 = vpack.c.bf16 %v393_v37, %v390_v31 }
 0x156   : > { %690 = vst [vmem:[%s176_s15 + $0x18] sm:$0xff] %v666_v34   ;;  %694 = vst [vmem:[%s176_s15 + $0x38] sm:$0xff] %v686_v35  }
 0x157   : > { %689 = vst [vmem:[%s176_s15 + $0x10] sm:$0xff] %v661_v38   ;;  %693 = vst [vmem:[%s176_s15 + $0x30] sm:$0xff] %v681_v39  }
 0x158   : > { %907 = shalt.err (!%p904_p7)
}
 0x159   : > { %s908_s20 = scalar_lea.hbm %s1165_s22, 1024  ;;  %s912_s25 = scalar_lea.hbm %s1211_s2, 2048 }
 0x15a   : > { %p909_p9 = scmp.ne.s32.totalorder %s1165_s22, %s908_s20  ;;  %p913_p5 = scmp.lt.u32.totalorder %s1165_s22, %s1211_s2 }
 0x15b   : > { %p914_p11 = scmp.lt.u32.totalorder %s912_s25, %s908_s20  ;;  %p916_p4 = scmp.lt.u32.totalorder %s908_s20, %s1165_s22 }
 0x15c   : > { %p910_p1 = pnand %p909_p9, %p1082_p12 }
 0x15d   : > { %p915_p2 = por %p914_p11, %p913_p5 }
 0x15e   : > { %p911_p0 = pneg %p910_p1 }
 0x15f   : > { %p917_p6 = por %p916_p4, %p915_p2 }
 0x161   : > { %p918_p8 = pnand %p917_p6, %p911_p0 }
 0x163   : > { %921 = shalt.err (!%p918_p8)
}
 0x164   : > { %s971_s30 = smov 64   ;;  %s972_s23 = smov 4  }
 0x165   : > { %765 = dma.vmem_to_hbm [thread:$0]  (%p1082_p12), %s1160_s17, 1024, %s1165_s22, %s486_s13, %s971_s30, %s971_s30, %s972_s23  }
 0x166 PF: > { %s514_s15 = sand.u32 1, %s952_s9   ;;  %p1226_p10 = scmp.ne.s32.totalorder %s1216_s16, 0 }
 0x167   : > { %p1227_p13 = scmp.ge.s32.totalorder %s964_s12, 2  ;;  %s515_s4 = scalar_lea.sflag [#allocation4], %s514_s15 }
 0x169   : > { %p776_p3 = pnand %p1227_p13, %p1226_p10 }
 0x16b   : > { %947 = dma.done.wait (!%p776_p3), %s515_s4, 1024  }
 0x16c   : > { %949 = vsyncadd (!%p776_p3), %s515_s4, 4294966272  ;;  %p16_p7 = scmp.ge.s32.totalorder %s1044_s21, 4   ;;  %s1228_s9 = smov %s956_s10 }
 0x16d   : > { %s1229_s10 = smov %s960_s11  ;;  %s1230_s11 = smov %s1078_s8 }
 0x16e   : > { %s1231_s12 = smov %s1044_s21  ;;  %18 = sbr.rel (!%p16_p7) target bundleno = 6 (0x6), region = 77 }
 0x175   :  { %520 = vsyncpa [#allocation3], 1 }
 0x176   :  { %522 = vsyncpa [#allocation3 + $0x1], 1 }
 0x177   :  { %523 = vsyncpa [#allocation6], 1 }
 0x178   :  { %524 = vsyncpa [#allocation4], 1 }
 0x179   :  { %526 = vsyncpa [#allocation4 + $0x1], 1 }

</bundles_post_ra>
